<compile_context>
chip_gen: v6e
topology: v6e:2x2x1
jax: 0.10.0
libtpu: 0.0.40
codegen_flags: <defaults>
</compile_context>

<pallas_src>
import functools

import jax
import jax.numpy as jnp
from jax import lax
from jax.experimental import pallas as pl
from jax.experimental.pallas import tpu as pltpu


def _gsl_kernel(n, feat_ref, w_ref, adj_ref):
    """Single-block GSL forward.

    feat_ref: [NP, DP] f32, zero-padded outside [n, d].
    w_ref:    [DP, DP] f32, zero-padded outside [d, d].
    adj_ref:  [NP, NP] f32 output; only [:n, :n] is meaningful (rest written 0).
    """
    feat = feat_ref[...]
    w = w_ref[...]
    npad = feat.shape[0]
    dpad = feat.shape[1]

    # P = feature @ W on the MXU (padded rows/cols stay exactly zero).
    p = jnp.dot(feat, w, preferred_element_type=jnp.float32)          # [NP, DP]

    # Gram matrix G = P @ P^T, contracting the last dim of both operands
    # (no explicit transpose -> no XLU relayout).
    g = lax.dot_general(p, p, (((1,), (1,)), ((), ())),
                        preferred_element_type=jnp.float32)           # [NP, NP]

    # Row squared norms r_i (lane reduce) and their column-broadcast r_j.
    # The column broadcast is produced with a ones-matmul on the otherwise idle
    # MXU rather than a sublane<->lane transpose/relayout.
    p2 = p * p
    r_row = jnp.sum(p2, axis=-1, keepdims=True)                       # [NP, 1]
    ones = jnp.ones((npad, dpad), jnp.float32)
    r_col = lax.dot_general(ones, p2, (((1,), (1,)), ((), ())),
                            preferred_element_type=jnp.float32)       # [NP, NP] = r_j

    row_ids = lax.broadcasted_iota(jnp.int32, (npad, npad), 0)
    col_ids = lax.broadcasted_iota(jnp.int32, (npad, npad), 1)

    # ||p_i - p_j||^2, clamped at 0; diagonal pinned to exactly 0.
    sq = jnp.maximum(r_row + r_col - 2.0 * g, 0.0)
    sq = jnp.where(row_ids == col_ids, 0.0, sq)
    x = jnp.sqrt(sq + 1e-8)                                           # [NP, NP]

    # Valid [n, n] region (padded rows/cols excluded from all statistics).
    mask = (row_ids < n) & (col_ids < n)
    xm = jnp.where(mask, x, 0.0)

    # Unbiased std over the n*n valid entries — single fused pass.
    cnt = jnp.float32(n * n)
    s = jnp.sum(xm)
    ss = jnp.sum(xm * xm)
    var = (ss - s * s / cnt) / (cnt - 1.0)                            # sigma^2

    # y = exp((-x/2) * sigma^2) with the scalar hoisted: one VPU mul + EUP exp.
    scale = -0.5 * var
    y = jnp.where(mask, jnp.exp(x * scale), 0.0)

    # Global L2 normalize with eps=1e-12 on the norm:
    #   1 / max(||y||, 1e-12) == rsqrt(max(||y||^2, 1e-24)).
    inv_norm = lax.rsqrt(jnp.maximum(jnp.sum(y * y), 1e-24))
    adj_ref[...] = (y * inv_norm).astype(adj_ref.dtype)


def _round_up(v: int, m: int) -> int:
    return (v + m - 1) // m * m


@jax.jit
def gsl_forward(feature, weight):
    n, d = feature.shape
    # Pad to lane-dense shapes: 128-wide lanes for the [N, N] output (unmasked
    # stores) and a 128-wide MXU contraction (keeps v5e's 128-deep systolic
    # array fed instead of a 32-wide K).
    npad = _round_up(n, 128)
    dpad = _round_up(d, 128)

    feat_p = jnp.zeros((npad, dpad), jnp.float32).at[:n, :d].set(
        feature.astype(jnp.float32))
    w_p = jnp.zeros((dpad, dpad), jnp.float32).at[:d, :d].set(
        weight.astype(jnp.float32))

    cost = pl.CostEstimate(
        flops=2 * npad * dpad * dpad + 4 * npad * npad * dpad,
        transcendentals=npad * npad,
        bytes_accessed=4 * (npad * dpad + dpad * dpad + npad * npad),
    )

    # TODO(synk): for N beyond a few hundred, switch to a tiled grid over the
    # [N, N] output (P kept VMEM-resident, SMEM-staged global stats across an
    # "arbitrary" reduction axis, "parallel" row-tile axis for v7x's 2 TCs).
    adj_p = pl.pallas_call(
        functools.partial(_gsl_kernel, n),
        out_shape=jax.ShapeDtypeStruct((npad, npad), jnp.float32),
        in_specs=[
            pl.BlockSpec(memory_space=pltpu.MemorySpace.VMEM),
            pl.BlockSpec(memory_space=pltpu.MemorySpace.VMEM),
        ],
        out_specs=pl.BlockSpec(memory_space=pltpu.MemorySpace.VMEM),
        cost_estimate=cost,
    )(feat_p, w_p)
    return adj_p[:n, :n]


def gsl_reference(feature, weight):
    # Pure-JAX reference mirroring the PyTorch forward exactly.
    n = feature.shape[0]
    f = jnp.broadcast_to(feature[:, None, :], (n, n, feature.shape[1]))
    ft = jnp.transpose(f, (1, 0, 2))
    x3 = jnp.einsum("ijd,de->ije", f - ft, weight)
    x = jnp.sqrt(jnp.sum(x3 * x3, axis=2) + 1e-8)
    mean = jnp.mean(x)
    sigma = jnp.sqrt(jnp.sum((x - mean) ** 2) / (n * n - 1))
    y = jnp.exp(-x / 2.0 * sigma ** 2)
    norm = jnp.maximum(jnp.sqrt(jnp.sum(y * y)), 1e-12)
    return y / norm


if __name__ == "__main__":
    N, DIM = 8, 32  # n_nodes=8, feature dim=32

    key = jax.random.PRNGKey(0)
    k_feat, k_w = jax.random.split(key)
    feature = jax.random.normal(k_feat, (N, DIM), dtype=jnp.float32)
    # nn.init.normal_ on a [dim, dim] parameter (mean=0, std=1), deterministic.
    weight = jax.random.normal(k_w, (DIM, DIM), dtype=jnp.float32)

    adj = gsl_forward(feature, weight)
    jax.block_until_ready(adj)

    ref = gsl_reference(feature, weight)
    assert adj.shape == (N, N)
    assert jnp.allclose(adj, ref, atol=1e-5, rtol=1e-5), "mismatch vs reference"

    print("KERNEL_OK")
</pallas_src>

<mosaic_0001>
module attributes {stable_mosaic.version = 11 : i64} {
  func.func @_gsl_kernel(%arg0: memref<128x128xf32, #tpu.memory_space<vmem>>, %arg1: memref<128x128xf32, #tpu.memory_space<vmem>>, %arg2: memref<128x128xf32, #tpu.memory_space<vmem>>) attributes {dimension_semantics = [], scalar_prefetch = 0 : i64, scratch_operands = 0 : i64, tpu.core_type = #tpu.core_type<tc>} {
    %c0 = arith.constant 0 : index
    %c0_0 = arith.constant 0 : index
    %0 = vector.load %arg0[%c0, %c0_0] : memref<128x128xf32, #tpu.memory_space<vmem>>, vector<128x128xf32>
    %c0_1 = arith.constant 0 : index
    %c0_2 = arith.constant 0 : index
    %1 = vector.load %arg1[%c0_1, %c0_2] : memref<128x128xf32, #tpu.memory_space<vmem>>, vector<128x128xf32>
    %cst = arith.constant dense<0.000000e+00> : vector<128x128xf32>
    %2 = tpu.matmul %0, %1, %cst {dimension_numbers = #tpu.dot_dimension_numbers<[1], [0], [0], [1], [0, 0, 1, 1], [], []>} : vector<128x128xf32>, vector<128x128xf32>, vector<128x128xf32> -> vector<128x128xf32>
    %cst_3 = arith.constant dense<0.000000e+00> : vector<128x128xf32>
    %3 = tpu.matmul %2, %2, %cst_3 {dimension_numbers = #tpu.dot_dimension_numbers<[1], [1], [0], [0], [0, 0, 1, 0], [], []>} : vector<128x128xf32>, vector<128x128xf32>, vector<128x128xf32> -> vector<128x128xf32>
    %4 = arith.mulf %2, %2 : vector<128x128xf32>
    %cst_4 = arith.constant dense<0.000000e+00> : vector<128xf32>
    %5 = vector.multi_reduction <add>, %4, %cst_4 [1] : vector<128x128xf32> to vector<128xf32>
    %6 = vector.shape_cast %5 : vector<128xf32> to vector<128x1xf32>
    %cst_5 = arith.constant 1.000000e+00 : f32
    %7 = vector.broadcast %cst_5 : f32 to vector<128x128xf32>
    %cst_6 = arith.constant dense<0.000000e+00> : vector<128x128xf32>
    %8 = tpu.matmul %7, %4, %cst_6 {dimension_numbers = #tpu.dot_dimension_numbers<[1], [1], [0], [0], [0, 0, 1, 0], [], []>} : vector<128x128xf32>, vector<128x128xf32>, vector<128x128xf32> -> vector<128x128xf32>
    %9 = tpu.iota {dimensions = array<i32: 0>} : vector<128x128xi32>
    %10 = tpu.iota {dimensions = array<i32: 1>} : vector<128x128xi32>
    %11 = vector.broadcast %6 : vector<128x1xf32> to vector<128x128xf32>
    %12 = arith.addf %11, %8 : vector<128x128xf32>
    %cst_7 = arith.constant 2.000000e+00 : f32
    %13 = vector.broadcast %cst_7 : f32 to vector<128x128xf32>
    %14 = arith.mulf %13, %3 : vector<128x128xf32>
    %15 = arith.subf %12, %14 : vector<128x128xf32>
    %cst_8 = arith.constant 0.000000e+00 : f32
    %16 = vector.broadcast %cst_8 : f32 to vector<128x128xf32>
    %17 = arith.maximumf %15, %16 : vector<128x128xf32>
    %18 = arith.cmpi eq, %9, %10 : vector<128x128xi32>
    %cst_9 = arith.constant 0.000000e+00 : f32
    %19 = vector.broadcast %cst_9 : f32 to vector<128x128xf32>
    %20 = arith.select %18, %19, %17 : vector<128x128xi1>, vector<128x128xf32>
    %cst_10 = arith.constant 9.99999993E-9 : f32
    %21 = vector.broadcast %cst_10 : f32 to vector<128x128xf32>
    %22 = arith.addf %20, %21 : vector<128x128xf32>
    %23 = math.sqrt %22 : vector<128x128xf32>
    %c8_i32 = arith.constant 8 : i32
    %24 = vector.broadcast %c8_i32 : i32 to vector<128x128xi32>
    %25 = arith.cmpi slt, %9, %24 : vector<128x128xi32>
    %c8_i32_11 = arith.constant 8 : i32
    %26 = vector.broadcast %c8_i32_11 : i32 to vector<128x128xi32>
    %27 = arith.cmpi slt, %10, %26 : vector<128x128xi32>
    %28 = arith.andi %25, %27 : vector<128x128xi1>
    %cst_12 = arith.constant 0.000000e+00 : f32
    %29 = vector.broadcast %cst_12 : f32 to vector<128x128xf32>
    %30 = arith.select %28, %23, %29 : vector<128x128xi1>, vector<128x128xf32>
    %31 = vector.shape_cast %30 : vector<128x128xf32> to vector<1x128x128xf32>
    %cst_13 = arith.constant dense<0.000000e+00> : vector<1xf32>
    %32 = vector.multi_reduction <add>, %31, %cst_13 [1, 2] : vector<1x128x128xf32> to vector<1xf32>
    %33 = vector.shape_cast %32 : vector<1xf32> to vector<1x1x1xf32>
    %34 = vector.extract %33[0, 0, 0] : f32 from vector<1x1x1xf32>
    %35 = arith.mulf %30, %30 : vector<128x128xf32>
    %36 = vector.shape_cast %35 : vector<128x128xf32> to vector<1x128x128xf32>
    %cst_14 = arith.constant dense<0.000000e+00> : vector<1xf32>
    %37 = vector.multi_reduction <add>, %36, %cst_14 [1, 2] : vector<1x128x128xf32> to vector<1xf32>
    %38 = vector.shape_cast %37 : vector<1xf32> to vector<1x1x1xf32>
    %39 = vector.extract %38[0, 0, 0] : f32 from vector<1x1x1xf32>
    %40 = arith.mulf %34, %34 : f32
    %cst_15 = arith.constant 6.400000e+01 : f32
    %41 = arith.divf %40, %cst_15 : f32
    %42 = arith.subf %39, %41 : f32
    %cst_16 = arith.constant 6.400000e+01 : f32
    %cst_17 = arith.constant 1.000000e+00 : f32
    %43 = arith.subf %cst_16, %cst_17 : f32
    %44 = arith.divf %42, %43 : f32
    %cst_18 = arith.constant -5.000000e-01 : f32
    %45 = arith.mulf %cst_18, %44 : f32
    %46 = vector.broadcast %45 : f32 to vector<128x128xf32>
    %47 = arith.mulf %23, %46 : vector<128x128xf32>
    %48 = math.exp %47 : vector<128x128xf32>
    %cst_19 = arith.constant 0.000000e+00 : f32
    %49 = vector.broadcast %cst_19 : f32 to vector<128x128xf32>
    %50 = arith.select %28, %48, %49 : vector<128x128xi1>, vector<128x128xf32>
    %51 = arith.mulf %50, %50 : vector<128x128xf32>
    %52 = vector.shape_cast %51 : vector<128x128xf32> to vector<1x128x128xf32>
    %cst_20 = arith.constant dense<0.000000e+00> : vector<1xf32>
    %53 = vector.multi_reduction <add>, %52, %cst_20 [1, 2] : vector<1x128x128xf32> to vector<1xf32>
    %54 = vector.shape_cast %53 : vector<1xf32> to vector<1x1x1xf32>
    %55 = vector.extract %54[0, 0, 0] : f32 from vector<1x1x1xf32>
    %cst_21 = arith.constant 1.000000e-24 : f32
    %56 = arith.maximumf %55, %cst_21 : f32
    %57 = math.rsqrt %56 : f32
    %58 = vector.broadcast %57 : f32 to vector<128x128xf32>
    %59 = arith.mulf %50, %58 : vector<128x128xf32>
    %c0_22 = arith.constant 0 : index
    %c0_23 = arith.constant 0 : index
    %60 = vector.load %arg2[%c0_22, %c0_23] : memref<128x128xf32, #tpu.memory_space<vmem>>, vector<128x128xf32>
    tpu.vector_store %arg2[%c0_22, %c0_23], %59 {strides = array<i32>} : memref<128x128xf32, #tpu.memory_space<vmem>>, vector<128x128xf32>,
    return
  }
}

</mosaic_0001>

<bundles_post_ra>
// kernel: gsl_forward.1
= control target key start
LH: loop header
LB: loop body
LE: loop exit
PB: predicated region body
PF: predicated region fallthrough
CT: control target
= control target key end

     0   :  { %v1317_v32 = vmov 1.0   ;;  %s1318_s22 = smov 1e-24   ;;  %s1619_s1 = inlined_call_operand.vmem [shape: f32[128,128], index: 1, kind: input, shape index: {}]   ;;  %s1620_s0 = inlined_call_operand.vmem [shape: f32[128,128], index: 0, kind: input, shape index: {}]   ;;  %s1621_s2 = inlined_call_operand.vmem [shape: f32[128,128], index: 2, kind: output, shape index: {}]  }
   0x1   :  { %v42_v0 = vld [vmem:[%s1619_s1 + $0x78] sm:$0xff]  ;;  %v41_v1 = vld [vmem:[%s1619_s1 + $0x70] sm:$0xff]  ;;  %v40_v2 = vld [vmem:[%s1619_s1 + $0x68] sm:$0xff] }
   0x2   :  { %1133 = vmatprep.subr.mxu0 %v42_v0  ;;  %v39_v3 = vld [vmem:[%s1619_s1 + $0x60] sm:$0xff]  ;;  %v38_v5 = vld [vmem:[%s1619_s1 + $0x58] sm:$0xff]  ;;  %v37_v6 = vld [vmem:[%s1619_s1 + $0x50] sm:$0xff] }
   0x3   :  { %1134 = vmatpush3.msra.mxu0 %v42_v0  ;;  %v11_v4 = vld [vmem:[%s1620_s0] sm:$0xff]  ;;  %v36_v7 = vld [vmem:[%s1619_s1 + $0x48] sm:$0xff]  ;;  %v34_v9 = vld [vmem:[%s1619_s1 + $0x38] sm:$0xff] }
   0x4   :  { %1135 = vmatprep.subr.mxu0 %v41_v1  ;;  %1165 = vmatprep.mubr.f32.mxu0 %v11_v4  ;;  %v35_v8 = vld [vmem:[%s1619_s1 + $0x40] sm:$0xff]  ;;  %v33_v10 = vld [vmem:[%s1619_s1 + $0x30] sm:$0xff]  ;;  %v32_v11 = vld [vmem:[%s1619_s1 + $0x28] sm:$0xff] }
   0x5   :  { %1136 = vmatpush3.msra.mxu0 %v41_v1  ;;  %v31_v12 = vld [vmem:[%s1619_s1 + $0x20] sm:$0xff]  ;;  %v30_v13 = vld [vmem:[%s1619_s1 + $0x18] sm:$0xff]  ;;  %v29_v14 = vld [vmem:[%s1619_s1 + $0x10] sm:$0xff] }
   0x6   :  { %1137 = vmatprep.subr.mxu0 %v40_v2  ;;  %v28_v15 = vld [vmem:[%s1619_s1 + $0x8] sm:$0xff]  ;;  %v27_v16 = vld [vmem:[%s1619_s1] sm:$0xff]  ;;  %v13_v18 = vld [vmem:[%s1620_s0 + $0x10] sm:$0xff] }
   0x7   :  { %1138 = vmatpush3.msra.mxu0 %v40_v2  ;;  %v12_v17 = vld [vmem:[%s1620_s0 + $0x8] sm:$0xff]  ;;  %v14_v19 = vld [vmem:[%s1620_s0 + $0x18] sm:$0xff]  ;;  %v15_v20 = vld [vmem:[%s1620_s0 + $0x20] sm:$0xff]  ;;  %v526_v2 = vlaneseq }
   0x8   :  { %1139 = vmatprep.subr.mxu0 %v39_v3  ;;  %v16_v21 = vld [vmem:[%s1620_s0 + $0x28] sm:$0xff]  ;;  %v17_v22 = vld [vmem:[%s1620_s0 + $0x30] sm:$0xff]  ;;  %v18_v23 = vld [vmem:[%s1620_s0 + $0x38] sm:$0xff] }
   0x9   :  { %1140 = vmatpush3.msra.mxu0 %v39_v3  ;;  %v19_v24 = vld [vmem:[%s1620_s0 + $0x40] sm:$0xff]  ;;  %v20_v25 = vld [vmem:[%s1620_s0 + $0x48] sm:$0xff]  ;;  %v21_v26 = vld [vmem:[%s1620_s0 + $0x50] sm:$0xff] }
   0xa   :  { %1141 = vmatprep.subr.mxu0 %v38_v5  ;;  %v22_v27 = vld [vmem:[%s1620_s0 + $0x58] sm:$0xff]  ;;  %v23_v28 = vld [vmem:[%s1620_s0 + $0x60] sm:$0xff]  ;;  %v24_v29 = vld [vmem:[%s1620_s0 + $0x68] sm:$0xff] }
   0xb   :  { %1142 = vmatpush3.msra.mxu0 %v38_v5  ;;  %v25_v30 = vld [vmem:[%s1620_s0 + $0x70] sm:$0xff]  ;;  %v26_v31 = vld [vmem:[%s1620_s0 + $0x78] sm:$0xff] }
   0xc   :  { %1143 = vmatprep.subr.mxu0 %v37_v6 }
   0xd   :  { %1144 = vmatpush3.msra.mxu0 %v37_v6 }
   0xe   :  { %1145 = vmatprep.subr.mxu0 %v36_v7 }
   0xf   :  { %1146 = vmatpush3.msra.mxu0 %v36_v7 }
  0x10   :  { %1147 = vmatprep.subr.mxu0 %v35_v8 }
  0x11   :  { %1148 = vmatpush3.msra.mxu0 %v35_v8  ;;  %v527_v8 = vshrl.u32 %v526_v2, 7 }
  0x12   :  { %1149 = vmatprep.subr.mxu0 %v34_v9 }
  0x13   :  { %1150 = vmatpush3.msra.mxu0 %v34_v9  ;;  %v1563_v9 = vand.u32 127, %v526_v2 }
  0x14   :  { %1151 = vmatprep.subr.mxu0 %v33_v10 }
  0x15   :  { %1152 = vmatpush3.msra.mxu0 %v33_v10  ;;  %vm609_vm0 = vcmp.eq.s32.totalorder %v527_v8, %v1563_v9  ;;  %vm785_vm2 = vcmp.lt.s32.totalorder %v1563_v9, 8 }
  0x16   :  { %1153 = vmatprep.subr.mxu0 %v32_v11 }
  0x17   :  { %1154 = vmatpush3.msra.mxu0 %v32_v11 }
  0x18   :  { %1155 = vmatprep.subr.mxu0 %v31_v12 }
  0x19   :  { %1156 = vmatpush3.msra.mxu0 %v31_v12 }
  0x1a   :  { %1157 = vmatprep.subr.mxu0 %v30_v13 }
  0x1b   :  { %1158 = vmatpush3.msra.mxu0 %v30_v13 }
  0x1c   :  { %1159 = vmatprep.subr.mxu0 %v29_v14 }
  0x1d   :  { %1160 = vmatpush3.msra.mxu0 %v29_v14 }
  0x1e   :  { %1161 = vmatprep.subr.mxu0 %v28_v15 }
  0x1f   :  { %1162 = vmatpush3.msra.mxu0 %v28_v15 }
  0x20   :  { %1163 = vmatprep.subr.mxu0 %v27_v16 }
  0x21   :  { %1164 = vmatpush3.msra.mxu0 %v27_v16 }
  0x22   :  { %1166 = vmatmul.mubr.f32.vlgmr.msra.gmra.mxu0 %v12_v17 }
  0x23   :  { %1168 = vmatprep.mubr.f32.mxu0 %v13_v18 }
  0x26   :  { %1169 = vmatmul.mubr.f32.gmra.mxu0 %v14_v19 }
  0x27   :  { %1171 = vmatprep.mubr.f32.mxu0 %v15_v20 }
  0x2a   :  { %1172 = vmatmul.mubr.f32.gmra.mxu0 %v16_v21 }
  0x2b   :  { %1174 = vmatprep.mubr.f32.mxu0 %v17_v22 }
  0x2e   :  { %1175 = vmatmul.mubr.f32.gmra.mxu0 %v18_v23 }
  0x2f   :  { %1177 = vmatprep.mubr.f32.mxu0 %v19_v24 }
  0x32   :  { %1178 = vmatmul.mubr.f32.gmra.mxu0 %v20_v25 }
  0x33   :  { %1180 = vmatprep.mubr.f32.mxu0 %v21_v26 }
  0x36   :  { %1181 = vmatmul.mubr.f32.gmra.mxu0 %v22_v27 }
  0x37   :  { %1183 = vmatprep.mubr.f32.mxu0 %v23_v28 }
  0x3a   :  { %1184 = vmatmul.mubr.f32.gmra.mxu0 %v24_v29 }
  0x3b   :  { %1186 = vmatprep.mubr.f32.mxu0 %v25_v30 }
  0x3e   :  { %1187 = vmatmul.mubr.f32.gmra.mxu0 %v26_v31 }
  0x3f   :  { %1277 = vmatprep.mubr.f32.mxu0 %v1317_v32 }
  0xe2   :  { %v1431_v33 = vpop.f32.mrf.mxu0 }
  0xe3   :  { %v334_v0 = vmul.f32 %v1431_v33, %v1431_v33 }
  0xe4   :  { %v1433_v34 = vpop.f32.mrf.mxu0 }
  0xe5   :  { %1221 = vmatprep.mubr.f32.mxu1 %v1433_v34  ;;  %v1438_v35 = vmul.f32 %v1433_v34, %v1433_v34 }
  0xe6   :  { %v1440_v36 = vpop.f32.mrf.mxu0 }
  0xe7   :  { %349 = vadd.xlane.f32.xlu0 %v1438_v35  ;;  %v336_v62 = vmul.f32 %v1440_v36, %v1440_v36 }
  0xe8   :  { %v1443_v37 = vpop.f32.mrf.mxu0 }
  0xe9   :  { %v335_v63 = vmul.f32 %v1443_v37, %v1443_v37 }
  0xea   :  { %v1445_v38 = vpop.f32.mrf.mxu0 }
  0xeb   :  { %v338_v60 = vmul.f32 %v1445_v38, %v1445_v38 }
  0xec   :  { %v1447_v39 = vpop.f32.mrf.mxu0 }
  0xed   :  { %v337_v61 = vmul.f32 %v1447_v39, %v1447_v39 }
  0xee   :  { %v1449_v40 = vpop.f32.mrf.mxu0 }
  0xef   :  { %v340_v58 = vmul.f32 %v1449_v40, %v1449_v40 }
  0xf0   :  { %v1451_v41 = vpop.f32.mrf.mxu0 }
  0xf1   :  { %v339_v59 = vmul.f32 %v1451_v41, %v1451_v41 }
  0xf2   :  { %v1453_v42 = vpop.f32.mrf.mxu0 }
  0xf3   :  { %v342_v56 = vmul.f32 %v1453_v42, %v1453_v42 }
  0xf4   :  { %v1455_v43 = vpop.f32.mrf.mxu0 }
  0xf5   :  { %v341_v57 = vmul.f32 %v1455_v43, %v1455_v43 }
  0xf6   :  { %v1457_v44 = vpop.f32.mrf.mxu0 }
  0xf7   :  { %v344_v54 = vmul.f32 %v1457_v44, %v1457_v44 }
  0xf8   :  { %v1459_v45 = vpop.f32.mrf.mxu0 }
  0xf9   :  { %v343_v55 = vmul.f32 %v1459_v45, %v1459_v45 }
  0xfa   :  { %v1461_v46 = vpop.f32.mrf.mxu0 }
  0xfb   :  { %v346_v52 = vmul.f32 %v1461_v46, %v1461_v46 }
  0xfc   :  { %v1463_v47 = vpop.f32.mrf.mxu0 }
  0xfd   :  { %v345_v53 = vmul.f32 %v1463_v47, %v1463_v47 }
  0xfe   :  { %v1465_v48 = vpop.f32.mrf.mxu0 }
  0xff   :  { %1189 = vmatprep.subr.mxu1 %v1465_v48  ;;  %v348_v49 = vmul.f32 %v1465_v48, %v1465_v48 }
 0x100   :  { %v1470_v50 = vpop.f32.mrf.mxu0  ;;  %1190 = vmatpush3.xpose.msra.mxu1 %v1465_v48 }
 0x101   :  { %1191 = vmatprep.subr.mxu1 %v1470_v50  ;;  %1245 = vmatprep.subr.mxu0 %v348_v49  ;;  %v347_v51 = vmul.f32 %v1470_v50, %v1470_v50 }
 0x102   :  { %1246 = vmatpush3.xpose.msra.mxu0 %v348_v49 }
 0x103   :  { %1247 = vmatprep.subr.mxu0 %v347_v51 }
 0x104   :  { %1192 = vmatpush3.xpose.msra.mxu1 %v1470_v50 }
 0x105   :  { %1193 = vmatprep.subr.mxu1 %v1461_v46 }
 0x106   :  { %1248 = vmatpush3.xpose.msra.mxu0 %v347_v51 }
 0x107   :  { %1249 = vmatprep.subr.mxu0 %v346_v52 }
 0x108   :  { %1194 = vmatpush3.xpose.msra.mxu1 %v1461_v46 }
 0x109   :  { %1195 = vmatprep.subr.mxu1 %v1463_v47 }
 0x10a   :  { %1250 = vmatpush3.xpose.msra.mxu0 %v346_v52 }
 0x10b   :  { %1251 = vmatprep.subr.mxu0 %v345_v53 }
 0x10c   :  { %1196 = vmatpush3.xpose.msra.mxu1 %v1463_v47 }
 0x10d   :  { %1197 = vmatprep.subr.mxu1 %v1457_v44 }
 0x10e   :  { %1252 = vmatpush3.xpose.msra.mxu0 %v345_v53 }
 0x10f   :  { %1253 = vmatprep.subr.mxu0 %v344_v54 }
 0x110   :  { %1198 = vmatpush3.xpose.msra.mxu1 %v1457_v44 }
 0x111   :  { %1199 = vmatprep.subr.mxu1 %v1459_v45 }
 0x112   :  { %1254 = vmatpush3.xpose.msra.mxu0 %v344_v54 }
 0x113   :  { %1255 = vmatprep.subr.mxu0 %v343_v55 }
 0x114   :  { %1200 = vmatpush3.xpose.msra.mxu1 %v1459_v45 }
 0x115   :  { %1201 = vmatprep.subr.mxu1 %v1453_v42 }
 0x116   :  { %1256 = vmatpush3.xpose.msra.mxu0 %v343_v55 }
 0x117   :  { %1257 = vmatprep.subr.mxu0 %v342_v56 }
 0x118   :  { %1202 = vmatpush3.xpose.msra.mxu1 %v1453_v42 }
 0x119   :  { %1203 = vmatprep.subr.mxu1 %v1455_v43 }
 0x11a   :  { %1258 = vmatpush3.xpose.msra.mxu0 %v342_v56 }
 0x11b   :  { %1259 = vmatprep.subr.mxu0 %v341_v57 }
 0x11c   :  { %1204 = vmatpush3.xpose.msra.mxu1 %v1455_v43 }
 0x11d   :  { %1205 = vmatprep.subr.mxu1 %v1449_v40 }
 0x11e   :  { %1260 = vmatpush3.xpose.msra.mxu0 %v341_v57 }
 0x11f   :  { %1261 = vmatprep.subr.mxu0 %v340_v58 }
 0x120   :  { %1206 = vmatpush3.xpose.msra.mxu1 %v1449_v40 }
 0x121   :  { %1207 = vmatprep.subr.mxu1 %v1451_v41 }
 0x122   :  { %1262 = vmatpush3.xpose.msra.mxu0 %v340_v58 }
 0x123   :  { %1263 = vmatprep.subr.mxu0 %v339_v59 }
 0x124   :  { %1208 = vmatpush3.xpose.msra.mxu1 %v1451_v41 }
 0x125   :  { %1209 = vmatprep.subr.mxu1 %v1445_v38 }
 0x126   :  { %1264 = vmatpush3.xpose.msra.mxu0 %v339_v59 }
 0x127   :  { %1265 = vmatprep.subr.mxu0 %v338_v60 }
 0x128   :  { %1210 = vmatpush3.xpose.msra.mxu1 %v1445_v38 }
 0x129   :  { %1211 = vmatprep.subr.mxu1 %v1447_v39 }
 0x12a   :  { %1266 = vmatpush3.xpose.msra.mxu0 %v338_v60 }
 0x12b   :  { %1267 = vmatprep.subr.mxu0 %v337_v61 }
 0x12c   :  { %1212 = vmatpush3.xpose.msra.mxu1 %v1447_v39 }
 0x12d   :  { %1213 = vmatprep.subr.mxu1 %v1440_v36 }
 0x12e   :  { %1268 = vmatpush3.xpose.msra.mxu0 %v337_v61 }
 0x12f   :  { %1269 = vmatprep.subr.mxu0 %v336_v62 }
 0x130   :  { %1214 = vmatpush3.xpose.msra.mxu1 %v1440_v36 }
 0x131   :  { %1215 = vmatprep.subr.mxu1 %v1443_v37 }
 0x132   :  { %1270 = vmatpush3.xpose.msra.mxu0 %v336_v62 }
 0x133   :  { %1271 = vmatprep.subr.mxu0 %v335_v63 }
 0x134   :  { %1216 = vmatpush3.xpose.msra.mxu1 %v1443_v37 }
 0x135   :  { %1217 = vmatprep.subr.mxu1 %v1431_v33 }
 0x136   :  { %1272 = vmatpush3.xpose.msra.mxu0 %v335_v63 }
 0x137   :  { %1273 = vmatprep.subr.mxu0 %v334_v0 }
 0x138   :  { %1218 = vmatpush3.xpose.msra.mxu1 %v1431_v33 }
 0x139   :  { %1219 = vmatprep.subr.mxu1 %v1433_v34 }
 0x13a   :  { %1274 = vmatpush3.xpose.msra.mxu0 %v334_v0 }
 0x13b   :  { %1275 = vmatprep.subr.mxu0 %v1438_v35 }
 0x13c   :  { %1220 = vmatpush3.xpose.msra.mxu1 %v1433_v34 }
 0x13e   :  { %1276 = vmatpush3.xpose.msra.mxu0 %v1438_v35 }
 0x13f   :  { %1222 = vmatmul.mubr.f32.vlgmr.msra.gmra.mxu1 %v1431_v33 }
 0x140   :  { %1224 = vmatprep.mubr.f32.mxu1 %v1443_v37 }
 0x141   :  { %1278 = vmatmul.mubr.f32.vlgmr.msra.gmra.mxu0 %v1317_v32 }
 0x142   :  { %1280 = vmatprep.mubr.f32.mxu0 %v1317_v32 }
 0x143   :  { %1225 = vmatmul.mubr.f32.gmra.mxu1 %v1440_v36 }
 0x144   :  { %1227 = vmatprep.mubr.f32.mxu1 %v1447_v39 }
 0x145   :  { %1281 = vmatmul.mubr.f32.gmra.mxu0 %v1317_v32 }
 0x146   :  { %1283 = vmatprep.mubr.f32.mxu0 %v1317_v32 }
 0x147   :  { %1228 = vmatmul.mubr.f32.gmra.mxu1 %v1445_v38 }
 0x148   :  { %1230 = vmatprep.mubr.f32.mxu1 %v1451_v41 }
 0x149   :  { %1284 = vmatmul.mubr.f32.gmra.mxu0 %v1317_v32 }
 0x14a   :  { %1286 = vmatprep.mubr.f32.mxu0 %v1317_v32 }
 0x14b   :  { %1231 = vmatmul.mubr.f32.gmra.mxu1 %v1449_v40 }
 0x14c   :  { %1233 = vmatprep.mubr.f32.mxu1 %v1455_v43 }
 0x14d   :  { %1287 = vmatmul.mubr.f32.gmra.mxu0 %v1317_v32 }
 0x14e   :  { %1289 = vmatprep.mubr.f32.mxu0 %v1317_v32 }
 0x14f   :  { %1234 = vmatmul.mubr.f32.gmra.mxu1 %v1453_v42 }
 0x150   :  { %1236 = vmatprep.mubr.f32.mxu1 %v1459_v45 }
 0x151   :  { %1290 = vmatmul.mubr.f32.gmra.mxu0 %v1317_v32 }
 0x152   :  { %1292 = vmatprep.mubr.f32.mxu0 %v1317_v32 }
 0x153   :  { %1237 = vmatmul.mubr.f32.gmra.mxu1 %v1457_v44 }
 0x154   :  { %1239 = vmatprep.mubr.f32.mxu1 %v1463_v47 }
 0x155   :  { %1293 = vmatmul.mubr.f32.gmra.mxu0 %v1317_v32 }
 0x156   :  { %1295 = vmatprep.mubr.f32.mxu0 %v1317_v32 }
 0x157   :  { %1240 = vmatmul.mubr.f32.gmra.mxu1 %v1461_v46 }
 0x158   :  { %1242 = vmatprep.mubr.f32.mxu1 %v1470_v50 }
 0x159   :  { %1296 = vmatmul.mubr.f32.gmra.mxu0 %v1317_v32 }
 0x15a   :  { %1298 = vmatprep.mubr.f32.mxu0 %v1317_v32 }
 0x15b   :  { %1243 = vmatmul.mubr.f32.gmra.mxu1 %v1465_v48 }
 0x15d   :  { %1299 = vmatmul.mubr.f32.gmra.mxu0 %v1317_v32 }
 0x170   :  { %v350_v5 = vpop.xlane.xlu0 %349 }
 0x1ff   :  { %v1223_v1 = vpop.f32.mrf.mxu1 }
 0x201   :  { %v254_v3 = vpop.f32.mrf.mxu1  ;;  %v1279_v4 = vpop.f32.mrf.mxu0 }
 0x202   :  { %v561_v10 = vmul.f32 2.0, %v254_v3 }
 0x203   :  { %v1226_v6 = vpop.f32.mrf.mxu1  ;;  %v447_v7 = vpop.f32.mrf.mxu0 }
 0x204   :  { %v545_v11 = vadd.f32 %v447_v7, %v350_v5 }
 0x205   :  { %v264_v12 = vpop.f32.mrf.mxu1  ;;  %v1282_v13 = vpop.f32.mrf.mxu0 }
 0x206   :  { %v577_v14 = vsub.f32 %v545_v11, %v561_v10 }
 0x207   :  { %v1229_v15 = vpop.f32.mrf.mxu1  ;;  %v457_v16 = vpop.f32.mrf.mxu0 }
 0x208   :  { %v593_v17 = vmax.f32 %v577_v14, 0.0 }
 0x209   :  { %v274_v18 = vpop.f32.mrf.mxu1  ;;  %v1285_v19 = vpop.f32.mrf.mxu0 }
 0x20a   :  { %v625_v20 = vsel %vm609_vm0, 0.0, %v593_v17 }
 0x20b   :  { %v1232_v21 = vpop.f32.mrf.mxu1  ;;  %v641_v22 = vadd.f32 1e-08, %v625_v20  ;;  %v467_v23 = vpop.f32.mrf.mxu0 }
 0x20d   :  { %v284_v24 = vpop.f32.mrf.mxu1  ;;  %1311 = vrsqrt.f32 %v641_v22  ;;  %v1288_v25 = vpop.f32.mrf.mxu0  ;;  %vm659_vm1 = vcmp.eq.f32.partialorder %v641_v22, inf  ;;  %v662_v42 = vand.u32 2147483648, %v641_v22  ;;  %vm661_vm3 = vcmp.eq.f32.partialorder %v641_v22, 0.0 }
 0x20f   :  { %v1235_v26 = vpop.f32.mrf.mxu1  ;;  %v477_v27 = vpop.f32.mrf.mxu0 }
 0x211   :  { %v294_v28 = vpop.f32.mrf.mxu1  ;;  %v1291_v29 = vpop.f32.mrf.mxu0 }
 0x213   :  { %v1238_v30 = vpop.f32.mrf.mxu1  ;;  %v487_v31 = vpop.f32.mrf.mxu0 }
 0x215   :  { %v304_v32 = vpop.f32.mrf.mxu1  ;;  %v1294_v33 = vpop.f32.mrf.mxu0 }
 0x217   :  { %v1241_v34 = vpop.f32.mrf.mxu1  ;;  %v497_v35 = vpop.f32.mrf.mxu0 }
 0x219   :  { %v314_v36 = vpop.f32.mrf.mxu1  ;;  %v1297_v37 = vpop.f32.mrf.mxu0 }
 0x21a   :  { %v1312_v38 = vpop.eup %1311 }
 0x21b   :  { %v1244_v39 = vpop.f32.mrf.mxu1  ;;  %v658_v40 = vmul.f32 %v1312_v38, %v641_v22  ;;  %v507_v41 = vpop.f32.mrf.mxu0 }
 0x21d   :  { %v324_v43 = vpop.f32.mrf.mxu1  ;;  %v660_v44 = vsel %vm659_vm1, %v641_v22, %v658_v40  ;;  %v1300_v45 = vpop.f32.mrf.mxu0 }
 0x21e   :  { %v663_v46 = vsel %vm661_vm3, %v662_v42, %v660_v44 }
 0x21f   :  { %v802_v47 = vsel %vm785_vm2, %v663_v46, 0.0  ;;  %v517_v48 = vpop.f32.mrf.mxu0 }
 0x220   :  { %833 = vadd.xlane.f32.xlu0 %v802_v47  ;;  %v842_v49 = vmul.f32 %v802_v47, %v802_v47 }
 0x222   :  { %873 = vadd.xlane.f32.xlu1 %v842_v49 }
 0x2a9   :  { %v834_v50 = vpop.xlane.xlu0 %833 }
 0x2aa   :  { %v835_v51 = vrot.slane %v834_v50, 4 }
 0x2ab   :  { %v874_v52 = vpop.xlane.xlu1 %873 }
 0x2ac   :  { %v836_v53 = vadd.f32 %v835_v51, %v834_v50  ;;  %v875_v54 = vrot.slane %v874_v52, 4 }
 0x2ae   :  { %v837_v55 = vrot.slane %v836_v53, 2  ;;  %v876_v56 = vadd.f32 %v875_v54, %v874_v52 }
 0x2b0   :  { %v877_v57 = vrot.slane %v876_v56, 2  ;;  %v838_v58 = vadd.f32 %v837_v55, %v836_v53 }
 0x2b2   :  { %v839_v59 = vrot.slane %v838_v58, 1  ;;  %v878_v60 = vadd.f32 %v877_v57, %v876_v56 }
 0x2b4   :  { %v840_v61 = vadd.f32 %v839_v59, %v838_v58  ;;  %v879_v62 = vrot.slane %v878_v60, 1 }
 0x2b6   :  { %1301 = vpush %v840_v61  ;;  %v880_v63 = vadd.f32 %v879_v62, %v878_v60 }
 0x2b8   :  { %1303 = vpush %v880_v63 }
 0x2e7   :  { %s1302_s0 = spop %1301 }
 0x2e8   :  { %s882_s16 = smul.f32 %s1302_s0, %s1302_s0 }
 0x2e9   :  { %s1304_s18 = spop %1303 }
 0x2ea   :  { %s885_s17 = smul.f32 0.015625, %s882_s16 }
 0x2ec   :  { %s886_s19 = ssub.f32 %s1304_s18, %s885_s17 }
 0x2ee   :  { %s889_s20 = smul.f32 0.015873017, %s886_s19 }
 0x2f0   :  { %s890_s21 = smul.f32 -0.5, %s889_s20 }
 0x2f2   :  { %v891_v0 = vstv %s890_s21 }
 0x2f3   :  { %v892_v1 = vmul.f32 %v891_v0, %v663_v46 }
 0x2f5   :  { %v908_v2 = vmul.f32 1.442695, %v892_v1 }
 0x2f7   :  { %1313 = vpow2.f32 %v908_v2 }
 0x304   :  { %v1314_v3 = vpop.eup %1313 }
 0x305   :  { %v940_v4 = vsel %vm785_vm2, %v1314_v3, 0.0 }
 0x306   :  { %v956_v5 = vmul.f32 %v940_v4, %v940_v4 }
 0x308   :  { %987 = vadd.xlane.f32.xlu1 %v956_v5 }
 0x391   :  { %v988_v6 = vpop.xlane.xlu1 %987 }
 0x392   :  { %v989_v7 = vrot.slane %v988_v6, 4 }
 0x394   :  { %v990_v8 = vadd.f32 %v989_v7, %v988_v6 }
 0x396   :  { %v991_v10 = vrot.slane %v990_v8, 2 }
 0x398   :  { %v992_v11 = vadd.f32 %v991_v10, %v990_v8 }
 0x39a   :  { %v993_v12 = vrot.slane %v992_v11, 1 }
 0x39c   :  { %v994_v13 = vadd.f32 %v993_v12, %v992_v11 }
 0x39e   :  { %1305 = vpush %v994_v13 }
 0x3cf   :  { %s1306_s1 = spop %1305 }
 0x3d0   :  { %s996_s23 = smax.f32 %s1318_s22, %s1306_s1 }
 0x3d1   :  { %v997_v14 = vstv %s996_s23 }
 0x3d2   :  { %1315 = vrsqrt.f32 %v997_v14 }
 0x3df   :  { %v1316_v15 = vpop.eup %1315 }
 0x3e0   :  { %1307 = vpush %v1316_v15 }
 0x411   :  { %s1308_s24 = spop %1307 }
 0x412   :  { %v1000_v9 = vstv %s1308_s24 }
 0x413   :  { %v1001_v16 = vmul.f32 %v1000_v9, %v940_v4  ;;  %v1002_v17 = vmul.f32 0.0, %v1000_v9 }
 0x415   :  { %1017 = vst [vmem:[%s1621_s2] sm:$0xff] %v1001_v16  ;;  %1018 = vst [vmem:[%s1621_s2 + $0x8] sm:$0xff] %v1002_v17 }
 0x416   :  { %1019 = vst [vmem:[%s1621_s2 + $0x10] sm:$0xff] %v1002_v17  ;;  %1020 = vst [vmem:[%s1621_s2 + $0x18] sm:$0xff] %v1002_v17 }
 0x417   :  { %1021 = vst [vmem:[%s1621_s2 + $0x20] sm:$0xff] %v1002_v17  ;;  %1022 = vst [vmem:[%s1621_s2 + $0x28] sm:$0xff] %v1002_v17 }
 0x418   :  { %1023 = vst [vmem:[%s1621_s2 + $0x30] sm:$0xff] %v1002_v17  ;;  %1024 = vst [vmem:[%s1621_s2 + $0x38] sm:$0xff] %v1002_v17 }
 0x419   :  { %1025 = vst [vmem:[%s1621_s2 + $0x40] sm:$0xff] %v1002_v17  ;;  %1026 = vst [vmem:[%s1621_s2 + $0x48] sm:$0xff] %v1002_v17 }
 0x41a   :  { %1027 = vst [vmem:[%s1621_s2 + $0x50] sm:$0xff] %v1002_v17  ;;  %1028 = vst [vmem:[%s1621_s2 + $0x58] sm:$0xff] %v1002_v17 }
 0x41b   :  { %1029 = vst [vmem:[%s1621_s2 + $0x60] sm:$0xff] %v1002_v17  ;;  %1030 = vst [vmem:[%s1621_s2 + $0x68] sm:$0xff] %v1002_v17 }
 0x41c   :  { %1031 = vst [vmem:[%s1621_s2 + $0x70] sm:$0xff] %v1002_v17  ;;  %1032 = vst [vmem:[%s1621_s2 + $0x78] sm:$0xff] %v1002_v17 }

</bundles_post_ra>
